<compile_context>
chip_gen: v6e
topology: v6e:2x2x1
jax: 0.10.0
libtpu: 0.0.40
codegen_flags: <defaults>
</compile_context>

<pallas_src>
import functools

import jax
import jax.numpy as jnp
from jax.experimental import pallas as pl
from jax.experimental.pallas import tpu as pltpu

# (cin, cout, kernel, stride, pad) — matches the nn.Conv2d args in the module.
LAYERS = [
    (3, 64, 4, 2, 1),
    (64, 128, 4, 2, 1),
    (128, 256, 4, 2, 1),
    (256, 512, 4, 1, 1),
    (512, 1, 4, 1, 1),
]

LEAKY_SLOPE = 0.2
IM2COL_K_MAX = 64          # pack taps into K when cin*k*k is tiny (layer 1)
ACC_BYTES_MAX = 128 * 1024  # cap on the in-register f32 accumulator (~32 vregs)


def _cout_block_max():
    """128-wide cout tiles on 128x128-MXU chips (v5 class), 256 otherwise."""
    try:
        kind = jax.devices()[0].device_kind.lower()
    except Exception:
        kind = ""
    return 128 if ("v5" in kind or "v4" in kind or "v3" in kind) else 256


def _vmem_limit_bytes():
    try:
        cap = int(pltpu.get_tpu_info().vmem_capacity_bytes)
        return min(64 * 1024 * 1024, cap // 2)
    except Exception:
        return 32 * 1024 * 1024


def _pick_slab(m_out, cout_blk):
    """Rows per in-register accumulator slab (multiple of 8, capped by vregs)."""
    max_rows = max(8, (ACC_BYTES_MAX // (cout_blk * 4)) // 8 * 8)
    return m_out if m_out <= max_rows else max_rows


# ----------------------------- Pallas kernels -------------------------------

def _conv_kernel(x_ref, w_ref, b_ref, o_ref, *, taps, m_out, slab, leaky_slope):
    """One conv layer for one (cout-tile, image): sum of shifted big GEMMs.

    x_ref: (n_phase, M_buf, K)    bf16  phase-split, spatially-flattened padded input
    w_ref: (n_taps, K, cout_blk)  bf16
    b_ref: (1, cout_blk)          f32
    o_ref: (M_out, cout_blk)      bf16  flat (lane/sublane-dense) output
    """
    cout_blk = o_ref.shape[-1]
    n_slabs = (m_out + slab - 1) // slab
    for si in range(n_slabs):                      # static, 1 slab at test sizes
        m0 = si * slab
        ms = min(slab, m_out - m0)
        acc = jnp.zeros((ms, cout_blk), jnp.float32)
        for t, (ph, off) in enumerate(taps):       # static tap unroll (<= 16)
            a = x_ref[ph, pl.ds(off + m0, ms), :]  # contiguous (ms, K) slab
            acc = acc + jnp.dot(a, w_ref[t], preferred_element_type=jnp.float32)
        r = acc + b_ref[...]
        if leaky_slope is not None:
            r = jnp.where(r >= 0.0, r, leaky_slope * r)
        o_ref[pl.ds(m0, ms), :] = r.astype(o_ref.dtype)


def _head_kernel(x_ref, cov_ref, b_ref, o_ref, *, inv_cnt):
    """Fused final conv (Cout=1) + spatial mean + sigmoid via a coverage map.

    x_ref: (N, M, C) bf16   cov_ref: (M, C) f32   b_ref: (1, 1) f32   o_ref: (N, 1) f32
    """
    x = x_ref[...].astype(jnp.float32)
    prod = x * cov_ref[...][None]
    s = jnp.sum(jnp.sum(prod, axis=-1), axis=-1)[:, None]     # (N, 1)
    logit = s * inv_cnt + b_ref[...]
    o_ref[...] = 1.0 / (1.0 + jnp.exp(-logit))


# ------------------------------ wrappers -------------------------------------

def conv_layer(x_nhwc, w_oihw, b, *, k, stride, pad, leaky_slope):
    """Returns (flat_out (N, Ho*Wq, Cout) bf16, (ho, wo, wq, cout))."""
    n, h, w_in, cin = x_nhwc.shape
    cout = w_oihw.shape[0]
    hp, wp = h + 2 * pad, w_in + 2 * pad
    ho = (hp - k) // stride + 1
    wo = (wp - k) // stride + 1

    xp = jnp.pad(x_nhwc, ((0, 0), (pad, pad), (pad, pad), (0, 0))).astype(jnp.bfloat16)

    if cin * k * k <= IM2COL_K_MAX:
        # Layer-1 path: pack the k*k taps into the contraction (K = cin*k*k).
        cols = [xp[:, kh:kh + stride * ho:stride, kw:kw + stride * wo:stride, :]
                for kh in range(k) for kw in range(k)]
        xflat = jnp.concatenate(cols, axis=-1).reshape(n, 1, ho * wo, cin * k * k)
        wmat = jnp.transpose(w_oihw, (2, 3, 1, 0)).reshape(
            1, cin * k * k, cout).astype(jnp.bfloat16)
        taps = ((0, 0),)
        m_out, wq_ext = ho * wo, wo
    else:
        # Double phase-split (H and W) + spatial flatten: every tap is a
        # contiguous row-slab; we compute Wq (>= Wo) columns per output row and
        # drop the garbage columns on the JAX side.
        assert hp % stride == 0 and wp % stride == 0
        hq, wq = hp // stride, wp // stride
        if stride > 1:
            xs = xp.reshape(n, hq, stride, wq, stride, cin).transpose(0, 2, 4, 1, 3, 5)
            xflat = xs.reshape(n, stride * stride, hq * wq, cin)
        else:
            xflat = xp.reshape(n, 1, hp * wp, cin)
        taps = tuple(((kh % stride) * stride + (kw % stride),
                      (kh // stride) * wq + (kw // stride))
                     for kh in range(k) for kw in range(k))
        m_out = ho * wq
        max_off = max(off for _, off in taps)
        pad_rows = max(0, max_off + m_out - hq * wq)
        if pad_rows:
            xflat = jnp.pad(xflat, ((0, 0), (0, 0), (0, pad_rows), (0, 0)))
        wmat = jnp.transpose(w_oihw, (2, 3, 1, 0)).reshape(
            k * k, cin, cout).astype(jnp.bfloat16)
        wq_ext = wq

    b2 = b.reshape(1, cout).astype(jnp.float32)

    cblk_max = _cout_block_max()
    cout_blk = cout if cout <= cblk_max else cblk_max
    assert cout % cout_blk == 0
    n_co = cout // cout_blk

    n_phase, m_buf, kdim = xflat.shape[1], xflat.shape[2], xflat.shape[3]
    slab = _pick_slab(m_out, cout_blk)

    kern = functools.partial(_conv_kernel, taps=taps, m_out=m_out, slab=slab,
                             leaky_slope=leaky_slope)

    flops = 2 * n * m_out * cout * kdim * len(taps)
    bytes_accessed = (xflat.size * 2) * n_co + wmat.size * 2 \
        + n * m_out * cout * 2 + cout * 4

    out_flat = pl.pallas_call(
        kern,
        out_shape=jax.ShapeDtypeStruct((n, m_out, cout), jnp.bfloat16),
        grid_spec=pltpu.PrefetchScalarGridSpec(
            num_scalar_prefetch=0,
            grid=(n_co, n),  # batch innermost -> weight tile stays VMEM-resident
            in_specs=[
                pl.BlockSpec((None, n_phase, m_buf, kdim), lambda j, nn: (nn, 0, 0, 0)),
                pl.BlockSpec((len(taps), kdim, cout_blk), lambda j, nn: (0, 0, j)),
                pl.BlockSpec((1, cout_blk), lambda j, nn: (0, j)),
            ],
            out_specs=pl.BlockSpec((None, m_out, cout_blk), lambda j, nn: (nn, 0, j)),
        ),
        compiler_params=pltpu.CompilerParams(
            dimension_semantics=("parallel", "parallel"),
            vmem_limit_bytes=_vmem_limit_bytes(),
        ),
        cost_estimate=pl.CostEstimate(flops=int(flops), transcendentals=0,
                                      bytes_accessed=int(bytes_accessed)),
    )(xflat, wmat, b2)

    return out_flat, (ho, wo, wq_ext, cout)


def _flat_to_nhwc(flat, geom):
    ho, wo, wq, cout = geom
    n = flat.shape[0]
    return flat.reshape(n, ho, wq, cout)[:, :, :wo, :]


def fused_head(y_flat, geom, w_oihw, b, *, k, pad):
    """Final conv (Cout=1) + spatial mean + sigmoid as one multiply-reduce."""
    n, m4, c = y_flat.shape
    h, w, wq4, _ = geom
    assert m4 == h * wq4
    hp, wp = h + 2 * pad, w + 2 * pad
    ho, wo = hp - k + 1, wp - k + 1

    # Coverage map: cov[p, q, c] = sum of w taps that touch padded pixel (p, q)
    # over all valid output positions; mean(conv(x)) == sum(x_pad * cov)/(Ho*Wo) + b.
    wk = jnp.transpose(w_oihw[0], (1, 2, 0)).astype(jnp.float32)   # (k, k, C)
    cov = jnp.zeros((hp, wp, c), jnp.float32)
    for kh in range(k):
        for kw in range(k):
            cov = cov.at[kh:kh + ho, kw:kw + wo, :].add(wk[kh, kw])
    cov_in = cov[pad:pad + h, pad:pad + w, :]                      # (h, w, C)
    # Express the map in the flat-extended layout of the previous layer's output
    # (zero weight on the garbage columns), so no reshape/slice of the activation.
    cov_flat = jnp.pad(cov_in, ((0, 0), (0, wq4 - w), (0, 0))).reshape(h * wq4, c)

    b2 = jnp.asarray(b, jnp.float32).reshape(1, 1)
    kern = functools.partial(_head_kernel, inv_cnt=1.0 / float(ho * wo))
    # TODO(synk): grid over batch / rows for large activations (VMEM scalability).
    return pl.pallas_call(
        kern,
        out_shape=jax.ShapeDtypeStruct((n, 1), jnp.float32),
        in_specs=[pl.BlockSpec(memory_space=pltpu.MemorySpace.VMEM)] * 3,
        out_specs=pl.BlockSpec(memory_space=pltpu.MemorySpace.VMEM),
    )(y_flat, cov_flat, b2)


def discriminator_forward(x_nchw, params):
    x = jnp.transpose(x_nchw, (0, 2, 3, 1))          # NHWC once, at the boundary
    flat, geom = None, None
    for (cin, cout, k, s, p), (w, b) in zip(LAYERS[:-1], params[:-1]):
        if flat is not None:
            x = _flat_to_nhwc(flat, geom)            # drop garbage columns + NHWC
        flat, geom = conv_layer(x, w, b, k=k, stride=s, pad=p,
                                leaky_slope=LEAKY_SLOPE)
    w5, b5 = params[-1]
    return fused_head(flat, geom, w5, b5, k=LAYERS[-1][2], pad=LAYERS[-1][4])


# ------------------------------ reference ------------------------------------

def init_params(key):
    params = []
    for cin, cout, k, _, _ in LAYERS:
        key, kw, kb = jax.random.split(key, 3)
        bound = 1.0 / float(cin * k * k) ** 0.5
        w = jax.random.uniform(kw, (cout, cin, k, k), jnp.float32, -bound, bound)
        b = jax.random.uniform(kb, (cout,), jnp.float32, -bound, bound)
        params.append((w, b))
    return params


def reference_forward(x, params):
    """Pure-JAX (XLA conv, f32) reference for correctness checking."""
    for idx, ((cin, cout, k, s, p), (w, b)) in enumerate(zip(LAYERS, params)):
        x = jax.lax.conv_general_dilated(
            x, w, (s, s), [(p, p), (p, p)],
            dimension_numbers=("NCHW", "OIHW", "NCHW"),
            precision=jax.lax.Precision.HIGHEST)
        x = x + b.reshape(1, cout, 1, 1)
        if idx < len(LAYERS) - 1:
            x = jnp.where(x >= 0, x, 0.2 * x)
    m = jnp.mean(jnp.mean(x, -1), -1)
    return jax.nn.sigmoid(m)


if __name__ == "__main__":
    key = jax.random.PRNGKey(0)
    key, kx = jax.random.split(key)
    # Needs 3 input channels; 32x32 keeps every conv output >= 2x2.
    x = jax.random.normal(kx, (2, 3, 32, 32), jnp.float32)
    params = init_params(key)

    out = jax.block_until_ready(discriminator_forward(x, params))
    ref = jax.block_until_ready(reference_forward(x, params))

    assert out.shape == (2, 1), out.shape
    assert jnp.allclose(out, ref, atol=2e-2, rtol=2e-2), (out, ref)

    print("KERNEL_OK")
</pallas_src>

<mosaic_0001>
module attributes {stable_mosaic.version = 11 : i64} {
  func.func @_conv_kernel(%arg0: i32, %arg1: i32, %arg2: memref<1x1x256x48xbf16, #tpu.memory_space<vmem>>, %arg3: memref<1x48x64xbf16, #tpu.memory_space<vmem>>, %arg4: memref<1x64xf32, #tpu.memory_space<vmem>>, %arg5: memref<1x256x64xbf16, #tpu.memory_space<vmem>>) attributes {dimension_semantics = [#tpu.dimension_semantics<parallel>, #tpu.dimension_semantics<parallel>], iteration_bounds = array<i64: 1, 2>, scalar_prefetch = 0 : i64, scratch_operands = 0 : i64, tpu.core_type = #tpu.core_type<tc>, window_params = [{transform_indices = @transform_0, window_bounds = array<i64: 1, 1, 256, 48>}, {transform_indices = @transform_1, window_bounds = array<i64: 1, 48, 64>}, {transform_indices = @transform_2, window_bounds = array<i64: 1, 64>}, {transform_indices = @transform_3, window_bounds = array<i64: 1, 256, 64>}]} {
    %cst = arith.constant 0.000000e+00 : f32
    %0 = vector.broadcast %cst : f32 to vector<256x64xf32>
    %c0 = arith.constant 0 : index
    %c0_0 = arith.constant 0 : index
    %c0_1 = arith.constant 0 : index
    %c0_2 = arith.constant 0 : index
    %1 = vector.load %arg2[%c0, %c0_0, %c0_1, %c0_2] : memref<1x1x256x48xbf16, #tpu.memory_space<vmem>>, vector<1x1x256x48xbf16>
    %2 = vector.shape_cast %1 : vector<1x1x256x48xbf16> to vector<256x48xbf16>
    %c0_3 = arith.constant 0 : index
    %c0_4 = arith.constant 0 : index
    %c0_5 = arith.constant 0 : index
    %3 = vector.load %arg3[%c0_3, %c0_4, %c0_5] : memref<1x48x64xbf16, #tpu.memory_space<vmem>>, vector<1x48x64xbf16>
    %4 = vector.shape_cast %3 : vector<1x48x64xbf16> to vector<48x64xbf16>
    %cst_6 = arith.constant dense<0.000000e+00> : vector<256x64xf32>
    %5 = tpu.matmul %2, %4, %cst_6 {dimension_numbers = #tpu.dot_dimension_numbers<[1], [0], [0], [1], [0, 0, 1, 1], [], []>} : vector<256x48xbf16>, vector<48x64xbf16>, vector<256x64xf32> -> vector<256x64xf32>
    %6 = arith.addf %0, %5 : vector<256x64xf32>
    %c0_7 = arith.constant 0 : index
    %c0_8 = arith.constant 0 : index
    %7 = vector.load %arg4[%c0_7, %c0_8] : memref<1x64xf32, #tpu.memory_space<vmem>>, vector<1x64xf32>
    %8 = vector.broadcast %7 : vector<1x64xf32> to vector<256x64xf32>
    %9 = arith.addf %6, %8 : vector<256x64xf32>
    %cst_9 = arith.constant 0.000000e+00 : f32
    %10 = vector.broadcast %cst_9 : f32 to vector<256x64xf32>
    %11 = arith.cmpf oge, %9, %10 : vector<256x64xf32>
    %cst_10 = arith.constant 2.000000e-01 : f32
    %12 = vector.broadcast %cst_10 : f32 to vector<256x64xf32>
    %13 = arith.mulf %12, %9 : vector<256x64xf32>
    %14 = arith.select %11, %9, %13 : vector<256x64xi1>, vector<256x64xf32>
    %15 = arith.truncf %14 : vector<256x64xf32> to vector<256x64xbf16>
    %c0_11 = arith.constant 0 : index
    %c0_12 = arith.constant 0 : index
    %c0_13 = arith.constant 0 : index
    %16 = vector.load %arg5[%c0_11, %c0_12, %c0_13] : memref<1x256x64xbf16, #tpu.memory_space<vmem>>, vector<1x256x64xbf16>
    %17 = vector.shape_cast %16 : vector<1x256x64xbf16> to vector<256x64xbf16>
    %18 = vector.shape_cast %15 : vector<256x64xbf16> to vector<1x256x64xbf16>
    tpu.vector_store %arg5[%c0_11, %c0_12, %c0_13], %18 {strides = array<i32>} : memref<1x256x64xbf16, #tpu.memory_space<vmem>>, vector<1x256x64xbf16>,
    return
  }
  func.func @transform_0(%arg0: i32, %arg1: i32) -> (i32, i32, i32, i32) {
    %c0_i32 = arith.constant 0 : i32
    %c0_i32_0 = arith.constant 0 : i32
    %c0_i32_1 = arith.constant 0 : i32
    %c0_i32_2 = arith.constant 0 : i32
    return %arg1, %c0_i32, %c0_i32_0, %c0_i32_1 : i32, i32, i32, i32
  }
  func.func @transform_1(%arg0: i32, %arg1: i32) -> (i32, i32, i32) {
    %c0_i32 = arith.constant 0 : i32
    %c0_i32_0 = arith.constant 0 : i32
    %c0_i32_1 = arith.constant 0 : i32
    return %c0_i32, %c0_i32_0, %arg0 : i32, i32, i32
  }
  func.func @transform_2(%arg0: i32, %arg1: i32) -> (i32, i32) {
    %c0_i32 = arith.constant 0 : i32
    %c0_i32_0 = arith.constant 0 : i32
    return %c0_i32, %arg0 : i32, i32
  }
  func.func @transform_3(%arg0: i32, %arg1: i32) -> (i32, i32, i32) {
    %c0_i32 = arith.constant 0 : i32
    %c0_i32_0 = arith.constant 0 : i32
    return %arg1, %c0_i32, %arg0 : i32, i32, i32
  }
}

</mosaic_0001>

<bundles_post_ra>
// kernel: tpu_custom_call.1
= control target key start
LH: loop header
LB: loop body
LE: loop exit
PB: predicated region body
PF: predicated region fallthrough
CT: control target
= control target key end

     0   :  { %s1203_s12 = smov 0   ;;  %s1205_s13 = smov 0   ;;  %s1391_s0 = inlined_call_operand.vmem [shape: bf16[2,1,256,48], index: 0, kind: input, shape index: {}]   ;;  %s1392_s1 = inlined_call_operand.vmem [shape: bf16[1,48,64], index: 1, kind: input, shape index: {}]   ;;  %s1393_s2 = inlined_call_operand.vmem [shape: f32[1,64], index: 2, kind: input, shape index: {}]   ;;  %s1394_s3 = inlined_call_operand.vmem [shape: bf16[2,256,64], index: 3, kind: output, shape index: {}]  }
   0x1   :  { %s1207_s14 = smov 0  }
   0x2 LB: > { %s22_s15 = sadd.s32 1, %s1177_s13  ;;  %p944_p0 = scmp.ge.s32.totalorder %s1181_s14, 1  ;;  %s1181_s14 = sphi %s1207_s14, %s13_s14   ;;  %s1177_s13 = sphi %s1205_s13, %s1396_s13   ;;  %s1173_s12 = sphi %s1203_s12, %s1395_s12  }
   0x3   : > { %p23_p1 = scmp.ge.s32.totalorder %s22_s15, 2  ;;  %p168_p2 = scmp.lt.s32.totalorder %s1181_s14, 3 }
   0x5   : > { %s1398_s15 = smov (%p23_p1, %s22_s15), 0  ;;  %p169_p3 = pnand %p944_p0, %p168_p2 }
   0x6   : > { %p202_p4 = scmp.lt.s32.totalorder (!%p169_p3), %s1173_s12, 1 }
   0x7   : > { %172 = sbr.rel (%p169_p3) target bundleno = 265 (0x109), region = 32 }
   0xc   : > { %v1140_v0 = vld [vmem:[%s1392_s1 + $0x10] sm:$0xff]   ;;  %v1141_v1 = vld [vmem:[%s1392_s1 + $0x8] sm:$0xff]   ;;  %s1400_s12 = smov (!%p202_p4, %s1173_s12), 1  ;;  %v1142_v2 = vld [vmem:[%s1392_s1] sm:$0xff]   ;;  %vm366_vm0 = vcmask 392192   ;;  %vm800_vm3 = vcmask 519168  }
   0xd   : > { %1072 = vmatprep.subr.bf16.mxu0 %v1140_v0  ;;  %1110 = vmatprep.subr.bf16.mxu1 %v1140_v0  ;;  %s1019_s22 = sshll.u32 %s1400_s12, 7  ;;  %v1275_v19 = vld [vmem:[%s1393_s2] ss:$0 sm:$0xff] }
   0xe   : > { %1073 = vmatpush3.bf16.msra.mxu0 %v1140_v0  ;;  %1113 = vmatpush3.bf16.msra.mxu1 %v1140_v0  ;;  %s1238_s25 = scalar_lea.vmem %s1391_s0, %s1019_s22  ;;  %s1286_s30 = scalar_lea.vmem %s1394_s3, %s1019_s22 }
   0xf   : > { %1074 = vmatprep.subr.bf16.mxu0 %v1141_v1  ;;  %1111 = vmatprep.subr.bf16.mxu1 %v1141_v1  ;;  %v1143_v3 = vld [vmem:[%s1238_s25] sm:$0xff]   ;;  %v1145_v5 = vld [vmem:[%s1238_s25 + $0x8] sm:$0xff]   ;;  %v1147_v7 = vld [vmem:[%s1238_s25 + $0x10] sm:$0xff]  }
  0x10   : > { %v1144_v4 = vld [vmem:[%s1238_s25 + $0x40] sm:$0xff]   ;;  %1078 = vmatprep.mubr.msk.bf16.mxu0 %vm366_vm0, %v1143_v3  ;;  %v1146_v6 = vld [vmem:[%s1238_s25 + $0x48] sm:$0xff]   ;;  %v1148_v8 = vld [vmem:[%s1238_s25 + $0x50] sm:$0xff]  }
  0x11   : > { %1094 = vmatprep.mubr.msk.bf16.mxu1 %vm366_vm0, %v1144_v4  ;;  %v1149_v9 = vld [vmem:[%s1238_s25 + $0x18] sm:$0xff]   ;;  %v1151_v11 = vld [vmem:[%s1238_s25 + $0x20] sm:$0xff]   ;;  %v1153_v13 = vld [vmem:[%s1238_s25 + $0x28] sm:$0xff]  }
  0x12   : > { %1075 = vmatpush3.bf16.msra.mxu0 %v1141_v1  ;;  %1114 = vmatpush3.bf16.msra.mxu1 %v1141_v1  ;;  %v1150_v10 = vld [vmem:[%s1238_s25 + $0x58] sm:$0xff]   ;;  %v1152_v12 = vld [vmem:[%s1238_s25 + $0x60] sm:$0xff]   ;;  %v1154_v14 = vld [vmem:[%s1238_s25 + $0x68] sm:$0xff]  }
  0x13   : > { %1076 = vmatprep.subr.bf16.mxu0 %v1142_v2  ;;  %1112 = vmatprep.subr.bf16.mxu1 %v1142_v2  ;;  %v1155_v15 = vld [vmem:[%s1238_s25 + $0x30] sm:$0xff]   ;;  %v1157_v17 = vld [vmem:[%s1238_s25 + $0x38] sm:$0xff]  }
  0x14   : > { %v1156_v16 = vld [vmem:[%s1238_s25 + $0x70] sm:$0xff]   ;;  %v1158_v18 = vld [vmem:[%s1238_s25 + $0x78] sm:$0xff]  }
  0x16   : > { %1077 = vmatpush3.bf16.msra.mxu0 %v1142_v2  ;;  %1115 = vmatpush3.bf16.msra.mxu1 %v1142_v2 }
  0x19   : > { %1079 = vmatmul.mubr.msk.bf16.vlgmr.msra.gmra.mxu0 %vm366_vm0, %v1145_v5  ;;  %1095 = vmatmul.mubr.msk.bf16.vlgmr.msra.gmra.mxu1 %vm366_vm0, %v1146_v6 }
  0x1a   : > { %1082 = vmatprep.mubr.msk.bf16.mxu0 %vm366_vm0, %v1147_v7  ;;  %1098 = vmatprep.mubr.msk.bf16.mxu1 %vm366_vm0, %v1148_v8 }
  0x21   : > { %1083 = vmatmul.mubr.msk.bf16.gmra.mxu0 %vm366_vm0, %v1149_v9  ;;  %1099 = vmatmul.mubr.msk.bf16.gmra.mxu1 %vm366_vm0, %v1150_v10 }
  0x22   : > { %1086 = vmatprep.mubr.msk.bf16.mxu0 %vm366_vm0, %v1151_v11  ;;  %1102 = vmatprep.mubr.msk.bf16.mxu1 %vm366_vm0, %v1152_v12 }
  0x29   : > { %1087 = vmatmul.mubr.msk.bf16.gmra.mxu0 %vm366_vm0, %v1153_v13  ;;  %1103 = vmatmul.mubr.msk.bf16.gmra.mxu1 %vm366_vm0, %v1154_v14 }
  0x2a   : > { %1090 = vmatprep.mubr.msk.bf16.mxu0 %vm366_vm0, %v1155_v15  ;;  %1106 = vmatprep.mubr.msk.bf16.mxu1 %vm366_vm0, %v1156_v16 }
  0x31   : > { %1091 = vmatmul.mubr.msk.bf16.gmra.mxu0 %vm366_vm0, %v1157_v17  ;;  %1107 = vmatmul.mubr.msk.bf16.gmra.mxu1 %vm366_vm0, %v1158_v18 }
  0xd9   : > { %v1080_v20 = vpop.f32.mrf.mxu0  ;;  %v1096_v21 = vpop.f32.mrf.mxu1 }
  0xda   : > { %v458_v22 = vadd.f32 %v1080_v20, %v1275_v19  ;;  %v522_v23 = vadd.f32 %v1096_v21, %v1275_v19 }
  0xdb   : > { %v449_v24 = vpop.f32.mrf.mxu0  ;;  %v513_v25 = vpop.f32.mrf.mxu1 }
  0xdc   : > { %vm578_vm1 = vcmp.ge.f32.partialorder %v458_v22, 0.0  ;;  %v610_v26 = vmul.f32 0.2, %v458_v22  ;;  %vm594_vm2 = vcmp.ge.f32.partialorder %v522_v23, 0.0  ;;  %v626_v27 = vmul.f32 0.2, %v522_v23 }
  0xdd   : > { %v450_v28 = vadd.f32 %v1275_v19, %v449_v24  ;;  %v514_v29 = vadd.f32 %v1275_v19, %v513_v25  ;;  %v1081_v30 = vpop.f32.mrf.mxu0  ;;  %v1097_v31 = vpop.f32.mrf.mxu1 }
  0xde   : > { %v642_v32 = vsel %vm578_vm1, %v458_v22, %v610_v26  ;;  %v658_v33 = vsel %vm594_vm2, %v522_v23, %v626_v27  ;;  %v461_v34 = vadd.f32 %v1081_v30, %v1275_v19  ;;  %v525_v35 = vadd.f32 %v1097_v31, %v1275_v19 }
  0xdf   : > { %v1023_v36 = vpack.c.bf16 %v642_v32, %v642_v32  ;;  %v1039_v37 = vpack.c.bf16 %v658_v33, %v658_v33  ;;  %vm576_vm4 = vcmp.ge.f32.partialorder %v450_v28, 0.0  ;;  %v608_v38 = vmul.f32 0.2, %v450_v28  ;;  %v452_v39 = vpop.f32.mrf.mxu0  ;;  %v516_v40 = vpop.f32.mrf.mxu1 }
  0xe0   : > { %vm592_vm5 = vcmp.ge.f32.partialorder %v514_v29, 0.0  ;;  %v624_v41 = vmul.f32 0.2, %v514_v29  ;;  %vm579_vm6 = vcmp.ge.f32.partialorder %v461_v34, 0.0  ;;  %v611_v42 = vmul.f32 0.2, %v461_v34 }
  0xe1   : > { %803 = vst.msk [vmem:[%s1286_s30 + $0x8] sm:$0xf] %vm800_vm3, %v1023_v36  ;;  %819 = vst.msk [vmem:[%s1286_s30 + $0x48] sm:$0xf] %vm800_vm3, %v1039_v37  ;;  %v640_v43 = vsel %vm576_vm4, %v450_v28, %v608_v38  ;;  %vm595_vm7 = vcmp.ge.f32.partialorder %v525_v35, 0.0  ;;  %v453_v45 = vadd.f32 %v1275_v19, %v452_v39  ;;  %v1084_v46 = vpop.f32.mrf.mxu0  ;;  %v1100_v47 = vpop.f32.mrf.mxu1  ;;  %v517_v51 = vadd.f32 %v1275_v19, %v516_v40 }
  0xe2   : > { %v627_v44 = vmul.f32 0.2, %v525_v35  ;;  %v1021_v48 = vpack.c.bf16 %v640_v43, %v640_v43  ;;  %v656_v49 = vsel %vm592_vm5, %v514_v29, %v624_v41  ;;  %v643_v50 = vsel %vm579_vm6, %v461_v34, %v611_v42 }
  0xe3   : > { %v1037_v52 = vpack.c.bf16 %v656_v49, %v656_v49  ;;  %v1024_v53 = vpack.c.bf16 %v643_v50, %v643_v50  ;;  %vm577_vm8 = vcmp.ge.f32.partialorder %v453_v45, 0.0  ;;  %v465_v55 = vpop.f32.mrf.mxu0  ;;  %v529_v56 = vpop.f32.mrf.mxu1  ;;  %v609_v58 = vmul.f32 0.2, %v453_v45 }
  0xe4   : > { %v659_v54 = vsel %vm595_vm7, %v525_v35, %v627_v44  ;;  %801 = vst.msk [vmem:[%s1286_s30] sm:$0xf] %vm800_vm3, %v1021_v48  ;;  %vm593_vm9 = vcmp.ge.f32.partialorder %v517_v51, 0.0  ;;  %v625_v59 = vmul.f32 0.2, %v517_v51  ;;  %v474_v60 = vadd.f32 %v1084_v46, %v1275_v19 }
  0xe5   : > { %v1040_v57 = vpack.c.bf16 %v659_v54, %v659_v54  ;;  %817 = vst.msk [vmem:[%s1286_s30 + $0x40] sm:$0xf] %vm800_vm3, %v1037_v52  ;;  %804 = vst.msk [vmem:[%s1286_s30 + $0xc] sm:$0xf] %vm800_vm3, %v1024_v53  ;;  %v538_v61 = vadd.f32 %v1100_v47, %v1275_v19  ;;  %v466_v62 = vadd.f32 %v1275_v19, %v465_v55  ;;  %v1085_v0 = vpop.f32.mrf.mxu0  ;;  %v1101_v1 = vpop.f32.mrf.mxu1 }
  0xe6   : > { %v530_v63 = vadd.f32 %v1275_v19, %v529_v56  ;;  %v641_v2 = vsel %vm577_vm8, %v453_v45, %v609_v58  ;;  %v657_v3 = vsel %vm593_vm9, %v517_v51, %v625_v59  ;;  %v477_v4 = vadd.f32 %v1085_v0, %v1275_v19 }
  0xe7   : > { %820 = vst.msk [vmem:[%s1286_s30 + $0x4c] sm:$0xf] %vm800_vm3, %v1040_v57  ;;  %v541_v5 = vadd.f32 %v1101_v1, %v1275_v19  ;;  %v1022_v6 = vpack.c.bf16 %v641_v2, %v641_v2  ;;  %v1038_v7 = vpack.c.bf16 %v657_v3, %v657_v3  ;;  %vm582_vm10 = vcmp.ge.f32.partialorder %v474_v60, 0.0  ;;  %v468_v9 = vpop.f32.mrf.mxu0  ;;  %v532_v10 = vpop.f32.mrf.mxu1 }
  0xe8   : > { %v614_v8 = vmul.f32 0.2, %v474_v60  ;;  %vm598_vm11 = vcmp.ge.f32.partialorder %v538_v61, 0.0  ;;  %v630_v11 = vmul.f32 0.2, %v538_v61  ;;  %vm580_vm12 = vcmp.ge.f32.partialorder %v466_v62, 0.0 }
  0xe9   : > { %v612_v12 = vmul.f32 0.2, %v466_v62  ;;  %802 = vst.msk [vmem:[%s1286_s30 + $0x4] sm:$0xf] %vm800_vm3, %v1022_v6  ;;  %818 = vst.msk [vmem:[%s1286_s30 + $0x44] sm:$0xf] %vm800_vm3, %v1038_v7  ;;  %v1088_v15 = vpop.f32.mrf.mxu0  ;;  %v1104_v16 = vpop.f32.mrf.mxu1  ;;  %v469_v30 = vadd.f32 %v1275_v19, %v468_v9  ;;  %v533_v32 = vadd.f32 %v1275_v19, %v532_v10 }
  0xea   : > { %v646_v13 = vsel %vm582_vm10, %v474_v60, %v614_v8  ;;  %vm596_vm13 = vcmp.ge.f32.partialorder %v530_v63, 0.0  ;;  %v628_v14 = vmul.f32 0.2, %v530_v63  ;;  %vm583_vm14 = vcmp.ge.f32.partialorder %v477_v4, 0.0 }
  0xeb   : > { %v1027_v17 = vpack.c.bf16 %v646_v13, %v646_v13  ;;  %v662_v18 = vsel %vm598_vm11, %v538_v61, %v630_v11  ;;  %v644_v20 = vsel %vm580_vm12, %v466_v62, %v612_v12  ;;  %v615_v21 = vmul.f32 0.2, %v477_v4  ;;  %v481_v25 = vpop.f32.mrf.mxu0  ;;  %v545_v26 = vpop.f32.mrf.mxu1 }
  0xec   : > { %v1043_v22 = vpack.c.bf16 %v662_v18, %v662_v18  ;;  %v1025_v23 = vpack.c.bf16 %v644_v20, %v644_v20  ;;  %v660_v24 = vsel %vm596_vm13, %v530_v63, %v628_v14  ;;  %vm599_vm15 = vcmp.ge.f32.partialorder %v541_v5, 0.0 }
  0xed   : > { %807 = vst.msk [vmem:[%s1286_s30 + $0x18] sm:$0xf] %vm800_vm3, %v1027_v17  ;;  %v1041_v27 = vpack.c.bf16 %v660_v24, %v660_v24  ;;  %v647_v28 = vsel %vm583_vm14, %v477_v4, %v615_v21  ;;  %v631_v29 = vmul.f32 0.2, %v541_v5  ;;  %v490_v33 = vadd.f32 %v1088_v15, %v1275_v19  ;;  %v1089_v35 = vpop.f32.mrf.mxu0  ;;  %v1105_v36 = vpop.f32.mrf.mxu1 }
  0xee   : > { %823 = vst.msk [vmem:[%s1286_s30 + $0x58] sm:$0xf] %vm800_vm3, %v1043_v22  ;;  %805 = vst.msk [vmem:[%s1286_s30 + $0x10] sm:$0xf] %vm800_vm3, %v1025_v23  ;;  %v1028_v31 = vpack.c.bf16 %v647_v28, %v647_v28  ;;  %v554_v34 = vadd.f32 %v1104_v16, %v1275_v19  ;;  %vm581_vm0 = vcmp.ge.f32.partialorder %v469_v30, 0.0  ;;  %v482_v39 = vadd.f32 %v1275_v19, %v481_v25 }
  0xef   : > { %821 = vst.msk [vmem:[%s1286_s30 + $0x50] sm:$0xf] %vm800_vm3, %v1041_v27  ;;  %v663_v37 = vsel %vm599_vm15, %v541_v5, %v631_v29  ;;  %v613_v38 = vmul.f32 0.2, %v469_v30  ;;  %vm597_vm1 = vcmp.ge.f32.partialorder %v533_v32, 0.0  ;;  %vm586_vm2 = vcmp.ge.f32.partialorder %v490_v33, 0.0  ;;  %v484_v42 = vpop.f32.mrf.mxu0  ;;  %v548_v43 = vpop.f32.mrf.mxu1 }
  0xf0   : > { %808 = vst.msk [vmem:[%s1286_s30 + $0x1c] sm:$0xf] %vm800_vm3, %v1028_v31  ;;  %v1044_v40 = vpack.c.bf16 %v663_v37, %v663_v37  ;;  %v629_v41 = vmul.f32 0.2, %v533_v32  ;;  %v618_v45 = vmul.f32 0.2, %v490_v33  ;;  %v546_v55 = vadd.f32 %v1275_v19, %v545_v26 }
  0xf1   : > { %v645_v44 = vsel %vm581_vm0, %v469_v30, %v613_v38  ;;  %vm602_vm4 = vcmp.ge.f32.partialorder %v554_v34, 0.0  ;;  %v634_v46 = vmul.f32 0.2, %v554_v34  ;;  %vm584_vm5 = vcmp.ge.f32.partialorder %v482_v39, 0.0  ;;  %v1092_v50 = vpop.f32.mrf.mxu0  ;;  %v1108_v51 = vpop.f32.mrf.mxu1 }
  0xf2   : > { %824 = vst.msk [vmem:[%s1286_s30 + $0x5c] sm:$0xf] %vm800_vm3, %v1044_v40  ;;  %v1026_v47 = vpack.c.bf16 %v645_v44, %v645_v44  ;;  %v661_v48 = vsel %vm597_vm1, %v533_v32, %v629_v41  ;;  %v616_v49 = vmul.f32 0.2, %v482_v39  ;;  %v650_v53 = vsel %vm586_vm2, %v490_v33, %v618_v45 }
  0xf3   : > { %v1042_v52 = vpack.c.bf16 %v661_v48, %v661_v48  ;;  %v666_v54 = vsel %vm602_vm4, %v554_v34, %v634_v46  ;;  %v1031_v56 = vpack.c.bf16 %v650_v53, %v650_v53  ;;  %v493_v59 = vadd.f32 %v1089_v35, %v1275_v19  ;;  %v497_v60 = vpop.f32.mrf.mxu0  ;;  %v561_v0 = vpop.f32.mrf.mxu1 }
  0xf4   : > { %806 = vst.msk [vmem:[%s1286_s30 + $0x14] sm:$0xf] %vm800_vm3, %v1026_v47  ;;  %v1047_v57 = vpack.c.bf16 %v666_v54, %v666_v54  ;;  %v648_v58 = vsel %vm584_vm5, %v482_v39, %v616_v49  ;;  %vm600_vm6 = vcmp.ge.f32.partialorder %v546_v55, 0.0  ;;  %v632_v62 = vmul.f32 0.2, %v546_v55 }
  0xf5   : > { %822 = vst.msk [vmem:[%s1286_s30 + $0x54] sm:$0xf] %vm800_vm3, %v1042_v52  ;;  %v1029_v61 = vpack.c.bf16 %v648_v58, %v648_v58  ;;  %v557_v63 = vadd.f32 %v1105_v36, %v1275_v19  ;;  %811 = vst.msk [vmem:[%s1286_s30 + $0x28] sm:$0xf] %vm800_vm3, %v1031_v56  ;;  %vm587_vm7 = vcmp.ge.f32.partialorder %v493_v59, 0.0  ;;  %v485_v2 = vadd.f32 %v1275_v19, %v484_v42  ;;  %v1093_v10 = vpop.f32.mrf.mxu0  ;;  %v1109_v14 = vpop.f32.mrf.mxu1 }
  0xf6   : > { %827 = vst.msk [vmem:[%s1286_s30 + $0x68] sm:$0xf] %vm800_vm3, %v1047_v57  ;;  %v619_v1 = vmul.f32 0.2, %v493_v59  ;;  %v549_v3 = vadd.f32 %v1275_v19, %v548_v43  ;;  %v664_v4 = vsel %vm600_vm6, %v546_v55, %v632_v62  ;;  %v506_v6 = vadd.f32 %v1092_v50, %v1275_v19 }
  0xf7   : > { %809 = vst.msk [vmem:[%s1286_s30 + $0x20] sm:$0xf] %vm800_vm3, %v1029_v61  ;;  %vm603_vm8 = vcmp.ge.f32.partialorder %v557_v63, 0.0  ;;  %v635_v5 = vmul.f32 0.2, %v557_v63  ;;  %v1045_v7 = vpack.c.bf16 %v664_v4, %v664_v4  ;;  %vm585_vm9 = vcmp.ge.f32.partialorder %v485_v2, 0.0  ;;  %v500_v27 = vpop.f32.mrf.mxu0  ;;  %v564_v30 = vpop.f32.mrf.mxu1 }
  0xf8   : > { %v651_v8 = vsel %vm587_vm7, %v493_v59, %v619_v1  ;;  %v617_v9 = vmul.f32 0.2, %v485_v2  ;;  %vm601_vm10 = vcmp.ge.f32.partialorder %v549_v3, 0.0  ;;  %v633_v13 = vmul.f32 0.2, %v549_v3 }
  0xf9   : > { %v1032_v11 = vpack.c.bf16 %v651_v8, %v651_v8  ;;  %v667_v12 = vsel %vm603_vm8, %v557_v63, %v635_v5  ;;  %825 = vst.msk [vmem:[%s1286_s30 + $0x60] sm:$0xf] %vm800_vm3, %v1045_v7  ;;  %vm590_vm11 = vcmp.ge.f32.partialorder %v506_v6, 0.0  ;;  %v622_v17 = vmul.f32 0.2, %v506_v6 }
  0xfa   : > { %v1048_v15 = vpack.c.bf16 %v667_v12, %v667_v12  ;;  %v649_v16 = vsel %vm585_vm9, %v485_v2, %v617_v9  ;;  %v665_v20 = vsel %vm601_vm10, %v549_v3, %v633_v13  ;;  %v570_v21 = vadd.f32 %v1108_v51, %v1275_v19 }
  0xfb   : > { %812 = vst.msk [vmem:[%s1286_s30 + $0x2c] sm:$0xf] %vm800_vm3, %v1032_v11  ;;  %v1030_v18 = vpack.c.bf16 %v649_v16, %v649_v16  ;;  %v498_v22 = vadd.f32 %v1275_v19, %v497_v60  ;;  %v1046_v23 = vpack.c.bf16 %v665_v20, %v665_v20  ;;  %v654_v24 = vsel %vm590_vm11, %v506_v6, %v622_v17 }
  0xfc   : > { %828 = vst.msk [vmem:[%s1286_s30 + $0x6c] sm:$0xf] %vm800_vm3, %v1048_v15  ;;  %v562_v25 = vadd.f32 %v1275_v19, %v561_v0  ;;  %v509_v26 = vadd.f32 %v1093_v10, %v1275_v19  ;;  %v1035_v28 = vpack.c.bf16 %v654_v24, %v654_v24  ;;  %vm606_vm12 = vcmp.ge.f32.partialorder %v570_v21, 0.0 }
  0xfd   : > { %810 = vst.msk [vmem:[%s1286_s30 + $0x24] sm:$0xf] %vm800_vm3, %v1030_v18  ;;  %v638_v29 = vmul.f32 0.2, %v570_v21  ;;  %vm588_vm13 = vcmp.ge.f32.partialorder %v498_v22, 0.0  ;;  %v573_v35 = vadd.f32 %v1109_v14, %v1275_v19  ;;  %v501_v36 = vadd.f32 %v1275_v19, %v500_v27 }
  0xfe   : > { %826 = vst.msk [vmem:[%s1286_s30 + $0x64] sm:$0xf] %vm800_vm3, %v1046_v23  ;;  %v620_v31 = vmul.f32 0.2, %v498_v22  ;;  %vm604_vm14 = vcmp.ge.f32.partialorder %v562_v25, 0.0  ;;  %vm591_vm15 = vcmp.ge.f32.partialorder %v509_v26, 0.0  ;;  %v565_v40 = vadd.f32 %v1275_v19, %v564_v30 }
  0xff   : > { %v636_v32 = vmul.f32 0.2, %v562_v25  ;;  %815 = vst.msk [vmem:[%s1286_s30 + $0x38] sm:$0xf] %vm800_vm3, %v1035_v28  ;;  %v670_v33 = vsel %vm606_vm12, %v570_v21, %v638_v29  ;;  %v623_v34 = vmul.f32 0.2, %v509_v26 }
 0x100   : > { %v1051_v37 = vpack.c.bf16 %v670_v33, %v670_v33  ;;  %v652_v38 = vsel %vm588_vm13, %v498_v22, %v620_v31  ;;  %vm607_vm0 = vcmp.ge.f32.partialorder %v573_v35, 0.0  ;;  %v639_v45 = vmul.f32 0.2, %v573_v35 }
 0x101   : > { %v668_v39 = vsel %vm604_vm14, %v562_v25, %v636_v32  ;;  %v1033_v41 = vpack.c.bf16 %v652_v38, %v652_v38  ;;  %v655_v43 = vsel %vm591_vm15, %v509_v26, %v623_v34  ;;  %vm589_vm1 = vcmp.ge.f32.partialorder %v501_v36, 0.0 }
 0x102   : > { %v1049_v42 = vpack.c.bf16 %v668_v39, %v668_v39  ;;  %831 = vst.msk [vmem:[%s1286_s30 + $0x78] sm:$0xf] %vm800_vm3, %v1051_v37  ;;  %v1036_v44 = vpack.c.bf16 %v655_v43, %v655_v43  ;;  %v621_v46 = vmul.f32 0.2, %v501_v36  ;;  %vm605_vm2 = vcmp.ge.f32.partialorder %v565_v40, 0.0 }
 0x103   : > { %813 = vst.msk [vmem:[%s1286_s30 + $0x30] sm:$0xf] %vm800_vm3, %v1033_v41  ;;  %v637_v47 = vmul.f32 0.2, %v565_v40  ;;  %v671_v19 = vsel %vm607_vm0, %v573_v35, %v639_v45 }
 0x104   : > { %829 = vst.msk [vmem:[%s1286_s30 + $0x70] sm:$0xf] %vm800_vm3, %v1049_v42  ;;  %816 = vst.msk [vmem:[%s1286_s30 + $0x3c] sm:$0xf] %vm800_vm3, %v1036_v44  ;;  %v653_v48 = vsel %vm589_vm1, %v501_v36, %v621_v46  ;;  %v1052_v49 = vpack.c.bf16 %v671_v19, %v671_v19 }
 0x105   : > { %v1034_v50 = vpack.c.bf16 %v653_v48, %v653_v48  ;;  %v669_v51 = vsel %vm605_vm2, %v565_v40, %v637_v47 }
 0x106   : > { %v1050_v52 = vpack.c.bf16 %v669_v51, %v669_v51  ;;  %832 = vst.msk [vmem:[%s1286_s30 + $0x7c] sm:$0xf] %vm800_vm3, %v1052_v49 }
 0x107   : > { %814 = vst.msk [vmem:[%s1286_s30 + $0x34] sm:$0xf] %vm800_vm3, %v1034_v50 }
 0x108   : > { %830 = vst.msk [vmem:[%s1286_s30 + $0x74] sm:$0xf] %vm800_vm3, %v1050_v52 }
 0x109 PF: > { %s13_s14 = sadd.s32 1, %s1181_s14   ;;  %s1395_s12 = smov %s1177_s13 }
 0x10a   : > { %p10_p5 = scmp.ge.s32.totalorder %s13_s14, 4   ;;  %s1396_s13 = smov %s1398_s15 }
 0x10c   :  { %12 = sbr.rel (!%p10_p5) target bundleno = 2 (0x2), region = 68 }

</bundles_post_ra>
